<compile_context>
chip_gen: v7x
topology: tpu7x:2x2x1
jax: 0.10.0
libtpu: 0.0.40
codegen_flags: <defaults>
</compile_context>

<pallas_src>
import functools

import jax
import jax.numpy as jnp
from jax.experimental import pallas as pl
from jax.experimental.pallas import tpu as pltpu


def _round_up(x, m):
    return (x + m - 1) // m * m


# ----------------------------------------------------------------------------
# Pallas kernel: fused Linear -> ReLU -> Linear -> ReLU -> Linear on one batch tile
# ----------------------------------------------------------------------------
def _mlp_kernel(x_ref, w1_ref, b1_ref, w2_ref, b2_ref, w3_ref, b3_ref, o_ref):
    x = x_ref[...]                                                     # (TB, D0) bf16

    # Layer 1: MXU matmul (bf16 operands, f32 accumulate) + bias + ReLU (f32 VPU).
    h = jnp.dot(x, w1_ref[...], preferred_element_type=jnp.float32)   # (TB, D1) f32
    h = jnp.maximum(h + b1_ref[...], 0.0)

    # Layer 2.
    h = jnp.dot(h.astype(w2_ref.dtype), w2_ref[...],
                preferred_element_type=jnp.float32)                   # (TB, D2) f32
    h = jnp.maximum(h + b2_ref[...], 0.0)

    # Layer 3 (output features padded to a multiple of 128 -> lane-dense store).
    h = jnp.dot(h.astype(w3_ref.dtype), w3_ref[...],
                preferred_element_type=jnp.float32)                   # (TB, D3_pad) f32
    h = h + b3_ref[...]

    o_ref[...] = h.astype(o_ref.dtype)                                 # unmasked vst


# ----------------------------------------------------------------------------
# Wrapper: padding, BlockSpecs, grid, cost estimate
# ----------------------------------------------------------------------------
@functools.partial(jax.jit, static_argnames=("tile_b", "compute_dtype"))
def modular_general_learner(x, params, *, tile_b=256, compute_dtype=jnp.bfloat16):
    """Run the blueprint (Linear/ReLU stack) via a single fused Pallas kernel."""
    w1, b1, w2, b2, w3, b3 = params
    B, D0 = x.shape
    D1 = w1.shape[1]
    D2 = w2.shape[1]
    D3 = w3.shape[1]

    # ---- batch tiling: no divisibility requirement, pad instead -------------
    b_pad_min = _round_up(B, 8)
    tb = min(tile_b, b_pad_min)          # clamp tile for small batches
    tb = _round_up(tb, 8)
    B_pad = _round_up(B, tb)
    if B_pad != B:
        x = jnp.pad(x, ((0, B_pad - B), (0, 0)))

    # ---- lane-dense output: pad last layer to a multiple of 128 features ----
    D3_pad = _round_up(D3, 128)
    if D3_pad != D3:
        w3 = jnp.pad(w3, ((0, 0), (0, D3_pad - D3)))
        b3 = jnp.pad(b3, ((0, 0), (0, D3_pad - D3)))

    # ---- bf16 MXU operands; biases / elementwise chain stay f32 -------------
    x_c = x.astype(compute_dtype)
    w1_c = w1.astype(compute_dtype)
    w2_c = w2.astype(compute_dtype)
    w3_c = w3.astype(compute_dtype)
    b1_f = b1.astype(jnp.float32)
    b2_f = b2.astype(jnp.float32)
    b3_f = b3.astype(jnp.float32)

    grid = (B_pad // tb,)

    # Weights/biases use full-extent blocks (same tile for every grid step);
    # only the activation tensors are tiled along batch.
    def full(shape):
        return pl.BlockSpec(shape, lambda i: tuple(0 for _ in shape))

    in_bytes = x_c.size * x_c.dtype.itemsize
    w_bytes = sum(a.size * a.dtype.itemsize for a in (w1_c, w2_c, w3_c, b1_f, b2_f, b3_f))
    out_bytes = B_pad * D3_pad * 4
    flops = 2 * B_pad * (D0 * D1 + D1 * D2 + D2 * D3_pad)

    out_padded = pl.pallas_call(
        _mlp_kernel,
        out_shape=jax.ShapeDtypeStruct((B_pad, D3_pad), jnp.float32),
        grid_spec=pltpu.PrefetchScalarGridSpec(
            num_scalar_prefetch=0,
            grid=grid,
            in_specs=[
                pl.BlockSpec((tb, D0), lambda i: (i, 0)),   # x tile (batch-tiled)
                full((D0, D1)), full((1, D1)),              # layer 1
                full((D1, D2)), full((1, D2)),              # layer 2
                full((D2, D3_pad)), full((1, D3_pad)),      # layer 3 (padded)
            ],
            out_specs=pl.BlockSpec((tb, D3_pad), lambda i: (i, 0)),
        ),
        compiler_params=pltpu.CompilerParams(
            dimension_semantics=("parallel",),
        ),
        cost_estimate=pl.CostEstimate(
            flops=flops,
            transcendentals=0,
            bytes_accessed=in_bytes + w_bytes + out_bytes,
        ),
    )(x_c, w1_c, b1_f, w2_c, b2_f, w3_c, b3_f)

    # Slice back to the true (B, D3) output, in the caller's dtype.
    return out_padded[:B, :D3].astype(x.dtype)


# ----------------------------------------------------------------------------
# Deterministic parameter init (mirrors nn.Linear shapes; synthetic, no checkpoint)
# ----------------------------------------------------------------------------
def init_params(key, dims=(32, 64, 64, 16), dtype=jnp.float32):
    params = []
    for i in range(len(dims) - 1):
        key, kw, kb = jax.random.split(key, 3)
        fan_in = dims[i]
        bound = 1.0 / float(fan_in) ** 0.5
        # stored as (in, out) == PyTorch weight.T
        w = jax.random.uniform(kw, (dims[i], dims[i + 1]), dtype, -bound, bound)
        b = jax.random.uniform(kb, (1, dims[i + 1]), dtype, -bound, bound)
        params += [w, b]
    return tuple(params)


def reference_forward(x, params):
    w1, b1, w2, b2, w3, b3 = params
    h = jnp.maximum(x @ w1 + b1, 0.0)
    h = jnp.maximum(h @ w2 + b2, 0.0)
    return h @ w3 + b3


if __name__ == "__main__":
    key = jax.random.PRNGKey(0)
    kx, kp = jax.random.split(key)

    B, D0 = 64, 32                      # small demo batch; tile auto-clamps/pads
    x = jax.random.normal(kx, (B, D0), dtype=jnp.float32)
    params = init_params(kp, dims=(D0, 64, 64, 16))

    out = modular_general_learner(x, params)     # default tile_b=256, bf16 operands
    out = jax.block_until_ready(out)

    ref = reference_forward(x, params)           # pure-f32 reference
    assert out.shape == (B, 16)
    # bf16 MXU operands with f32 accumulation -> ~1e-2 relative error budget.
    assert jnp.allclose(out, ref, atol=5e-2, rtol=5e-2), "mismatch vs reference"

    print("KERNEL_OK")
</pallas_src>

<mosaic_0001>
module attributes {stable_mosaic.version = 11 : i64} {
  func.func @_mlp_kernel(%arg0: i32, %arg1: memref<64x32xbf16, #tpu.memory_space<vmem>>, %arg2: memref<32x64xbf16, #tpu.memory_space<vmem>>, %arg3: memref<1x64xf32, #tpu.memory_space<vmem>>, %arg4: memref<64x64xbf16, #tpu.memory_space<vmem>>, %arg5: memref<1x64xf32, #tpu.memory_space<vmem>>, %arg6: memref<64x128xbf16, #tpu.memory_space<vmem>>, %arg7: memref<1x128xf32, #tpu.memory_space<vmem>>, %arg8: memref<64x128xf32, #tpu.memory_space<vmem>>) attributes {dimension_semantics = [#tpu.dimension_semantics<parallel>], iteration_bounds = array<i64: 1>, scalar_prefetch = 0 : i64, scratch_operands = 0 : i64, tpu.core_type = #tpu.core_type<tc>, window_params = [{transform_indices = @transform_0, window_bounds = array<i64: 64, 32>}, {pipeline_mode = #tpu.pipeline_mode<synchronous>, transform_indices = @transform_1, window_bounds = array<i64: 32, 64>}, {pipeline_mode = #tpu.pipeline_mode<synchronous>, transform_indices = @transform_2, window_bounds = array<i64: 1, 64>}, {pipeline_mode = #tpu.pipeline_mode<synchronous>, transform_indices = @transform_3, window_bounds = array<i64: 64, 64>}, {pipeline_mode = #tpu.pipeline_mode<synchronous>, transform_indices = @transform_4, window_bounds = array<i64: 1, 64>}, {pipeline_mode = #tpu.pipeline_mode<synchronous>, transform_indices = @transform_5, window_bounds = array<i64: 64, 128>}, {pipeline_mode = #tpu.pipeline_mode<synchronous>, transform_indices = @transform_6, window_bounds = array<i64: 1, 128>}, {transform_indices = @transform_7, window_bounds = array<i64: 64, 128>}]} {
    %c0 = arith.constant 0 : index
    %c0_0 = arith.constant 0 : index
    %0 = vector.load %arg1[%c0, %c0_0] : memref<64x32xbf16, #tpu.memory_space<vmem>>, vector<64x32xbf16>
    %c0_1 = arith.constant 0 : index
    %c0_2 = arith.constant 0 : index
    %1 = vector.load %arg2[%c0_1, %c0_2] : memref<32x64xbf16, #tpu.memory_space<vmem>>, vector<32x64xbf16>
    %cst = arith.constant dense<0.000000e+00> : vector<64x64xf32>
    %2 = tpu.matmul %0, %1, %cst {dimension_numbers = #tpu.dot_dimension_numbers<[1], [0], [0], [1], [0, 0, 1, 1], [], []>} : vector<64x32xbf16>, vector<32x64xbf16>, vector<64x64xf32> -> vector<64x64xf32>
    %c0_3 = arith.constant 0 : index
    %c0_4 = arith.constant 0 : index
    %3 = vector.load %arg3[%c0_3, %c0_4] : memref<1x64xf32, #tpu.memory_space<vmem>>, vector<1x64xf32>
    %4 = vector.broadcast %3 : vector<1x64xf32> to vector<64x64xf32>
    %5 = arith.addf %2, %4 : vector<64x64xf32>
    %cst_5 = arith.constant 0.000000e+00 : f32
    %6 = vector.broadcast %cst_5 : f32 to vector<64x64xf32>
    %7 = arith.maximumf %5, %6 : vector<64x64xf32>
    %8 = arith.truncf %7 : vector<64x64xf32> to vector<64x64xbf16>
    %c0_6 = arith.constant 0 : index
    %c0_7 = arith.constant 0 : index
    %9 = vector.load %arg4[%c0_6, %c0_7] : memref<64x64xbf16, #tpu.memory_space<vmem>>, vector<64x64xbf16>
    %cst_8 = arith.constant dense<0.000000e+00> : vector<64x64xf32>
    %10 = tpu.matmul %8, %9, %cst_8 {dimension_numbers = #tpu.dot_dimension_numbers<[1], [0], [0], [1], [0, 0, 1, 1], [], []>} : vector<64x64xbf16>, vector<64x64xbf16>, vector<64x64xf32> -> vector<64x64xf32>
    %c0_9 = arith.constant 0 : index
    %c0_10 = arith.constant 0 : index
    %11 = vector.load %arg5[%c0_9, %c0_10] : memref<1x64xf32, #tpu.memory_space<vmem>>, vector<1x64xf32>
    %12 = vector.broadcast %11 : vector<1x64xf32> to vector<64x64xf32>
    %13 = arith.addf %10, %12 : vector<64x64xf32>
    %cst_11 = arith.constant 0.000000e+00 : f32
    %14 = vector.broadcast %cst_11 : f32 to vector<64x64xf32>
    %15 = arith.maximumf %13, %14 : vector<64x64xf32>
    %16 = arith.truncf %15 : vector<64x64xf32> to vector<64x64xbf16>
    %c0_12 = arith.constant 0 : index
    %c0_13 = arith.constant 0 : index
    %17 = vector.load %arg6[%c0_12, %c0_13] : memref<64x128xbf16, #tpu.memory_space<vmem>>, vector<64x128xbf16>
    %cst_14 = arith.constant dense<0.000000e+00> : vector<64x128xf32>
    %18 = tpu.matmul %16, %17, %cst_14 {dimension_numbers = #tpu.dot_dimension_numbers<[1], [0], [0], [1], [0, 0, 1, 1], [], []>} : vector<64x64xbf16>, vector<64x128xbf16>, vector<64x128xf32> -> vector<64x128xf32>
    %c0_15 = arith.constant 0 : index
    %c0_16 = arith.constant 0 : index
    %19 = vector.load %arg7[%c0_15, %c0_16] : memref<1x128xf32, #tpu.memory_space<vmem>>, vector<1x128xf32>
    %20 = vector.broadcast %19 : vector<1x128xf32> to vector<64x128xf32>
    %21 = arith.addf %18, %20 : vector<64x128xf32>
    %c0_17 = arith.constant 0 : index
    %c0_18 = arith.constant 0 : index
    %22 = vector.load %arg8[%c0_17, %c0_18] : memref<64x128xf32, #tpu.memory_space<vmem>>, vector<64x128xf32>
    tpu.vector_store %arg8[%c0_17, %c0_18], %21 {strides = array<i32>} : memref<64x128xf32, #tpu.memory_space<vmem>>, vector<64x128xf32>,
    return
  }
  func.func @transform_0(%arg0: i32) -> (i32, i32) {
    %c0_i32 = arith.constant 0 : i32
    %c0_i32_0 = arith.constant 0 : i32
    return %arg0, %c0_i32 : i32, i32
  }
  func.func @transform_1(%arg0: i32) -> (i32, i32) {
    %c0_i32 = arith.constant 0 : i32
    %c0_i32_0 = arith.constant 0 : i32
    %c0_i32_1 = arith.constant 0 : i32
    return %c0_i32, %c0_i32_0 : i32, i32
  }
  func.func @transform_2(%arg0: i32) -> (i32, i32) {
    %c0_i32 = arith.constant 0 : i32
    %c0_i32_0 = arith.constant 0 : i32
    %c0_i32_1 = arith.constant 0 : i32
    return %c0_i32, %c0_i32_0 : i32, i32
  }
  func.func @transform_3(%arg0: i32) -> (i32, i32) {
    %c0_i32 = arith.constant 0 : i32
    %c0_i32_0 = arith.constant 0 : i32
    %c0_i32_1 = arith.constant 0 : i32
    return %c0_i32, %c0_i32_0 : i32, i32
  }
  func.func @transform_4(%arg0: i32) -> (i32, i32) {
    %c0_i32 = arith.constant 0 : i32
    %c0_i32_0 = arith.constant 0 : i32
    %c0_i32_1 = arith.constant 0 : i32
    return %c0_i32, %c0_i32_0 : i32, i32
  }
  func.func @transform_5(%arg0: i32) -> (i32, i32) {
    %c0_i32 = arith.constant 0 : i32
    %c0_i32_0 = arith.constant 0 : i32
    %c0_i32_1 = arith.constant 0 : i32
    return %c0_i32, %c0_i32_0 : i32, i32
  }
  func.func @transform_6(%arg0: i32) -> (i32, i32) {
    %c0_i32 = arith.constant 0 : i32
    %c0_i32_0 = arith.constant 0 : i32
    %c0_i32_1 = arith.constant 0 : i32
    return %c0_i32, %c0_i32_0 : i32, i32
  }
  func.func @transform_7(%arg0: i32) -> (i32, i32) {
    %c0_i32 = arith.constant 0 : i32
    %c0_i32_0 = arith.constant 0 : i32
    return %arg0, %c0_i32 : i32, i32
  }
}

</mosaic_0001>

<bundles_post_ra>
// kernel: modular_general_learner.1
= control target key start
LH: loop header
LB: loop body
LE: loop exit
PB: predicated region body
PF: predicated region fallthrough
CT: control target
= control target key end

     0   :  { %vm78_vm0 = vcmask 261120   ;;  %vm207_vm1 = vcmask 523264   ;;  %s661_s1 = inlined_call_operand.vmem [shape: bf16[32,64], index: 1, kind: input, shape index: {}]   ;;  %s662_s0 = inlined_call_operand.vmem [shape: bf16[64,32], index: 0, kind: input, shape index: {}]   ;;  %s663_s3 = inlined_call_operand.vmem [shape: bf16[64,64], index: 3, kind: input, shape index: {}]   ;;  %s664_s5 = inlined_call_operand.vmem [shape: bf16[64,128], index: 5, kind: input, shape index: {}]   ;;  %s665_s2 = inlined_call_operand.vmem [shape: f32[1,64], index: 2, kind: input, shape index: {}]   ;;  %s666_s4 = inlined_call_operand.vmem [shape: f32[1,64], index: 4, kind: input, shape index: {}]   ;;  %s667_s6 = inlined_call_operand.vmem [shape: f32[1,128], index: 6, kind: input, shape index: {}]   ;;  %s668_s7 = inlined_call_operand.vmem [shape: f32[64,128], index: 7, kind: output, shape index: {}]  }
   0x1   :  { %v520_v0 = vld [vmem:[%s661_s1] sm:$0xff]   ;;  %v521_v1 = vld [vmem:[%s661_s1 + $0x8] sm:$0xff]   ;;  %v524_v4 = vld [vmem:[%s662_s0 + $0x10] sm:$0xff]  }
   0x2   :  { %476 = vmatprep.subr.bf16.mxu0 %v520_v0  ;;  %v522_v2 = vld [vmem:[%s662_s0] sm:$0xff]   ;;  %v523_v3 = vld [vmem:[%s662_s0 + $0x8] sm:$0xff]   ;;  %v525_v7 = vld [vmem:[%s662_s0 + $0x18] sm:$0xff]  }
   0x3   :  { %477 = vmatpush3.bf16.msra.mxu0 %v520_v0  ;;  %480 = vmatprep.mubr.msk.bf16.mxu0 %vm78_vm0, %v522_v2  ;;  %v526_v5 = vld [vmem:[%s663_s3] sm:$0xff]   ;;  %v527_v6 = vld [vmem:[%s663_s3 + $0x8] sm:$0xff]   ;;  %v528_v8 = vld [vmem:[%s663_s3 + $0x10] sm:$0xff]  }
   0x4   :  { %478 = vmatprep.subr.bf16.mxu0 %v521_v1  ;;  %488 = vmatprep.subr.bf16.mxu1 %v526_v5  ;;  %v529_v9 = vld [vmem:[%s663_s3 + $0x18] sm:$0xff]   ;;  %v530_v10 = vld [vmem:[%s664_s5] sm:$0xff]   ;;  %v531_v11 = vld [vmem:[%s664_s5 + $0x8] sm:$0xff]  }
   0x5   :  { %489 = vmatpush3.bf16.msra.mxu1 %v526_v5  ;;  %v425_v12 = vld [vmem:[%s665_s2] ss:$0 sm:$0xff]  ;;  %v532_v41 = vld [vmem:[%s664_s5 + $0x10] sm:$0xff]   ;;  %v533_v42 = vld [vmem:[%s664_s5 + $0x18] sm:$0xff]  }
   0x6   :  { %490 = vmatprep.subr.bf16.mxu1 %v527_v6  ;;  %v436_v43 = vld [vmem:[%s666_s4] ss:$0 sm:$0xff] }
   0x7   :  { %479 = vmatpush3.bf16.msra.mxu0 %v521_v1 }
   0x8   :  { %504 = vmatprep.subr.bf16.mxu0 %v530_v10 }
   0x9   :  { %491 = vmatpush3.bf16.msra.mxu1 %v527_v6 }
   0xa   :  { %481 = vmatmul.mubr.msk.bf16.vlgmr.msra.gmra.mrb[0].mxu0 %vm78_vm0, %v523_v3  ;;  %492 = vmatprep.subr.bf16.mxu1 %v528_v8 }
   0xb   :  { %484 = vmatprep.mubr.msk.bf16.mxu0 %vm78_vm0, %v524_v4  ;;  %505 = vmatpush3.bf16.msra.mxu0 %v530_v10 }
   0xc   :  { %506 = vmatprep.subr.bf16.mxu0 %v531_v11 }
   0xd   :  { %493 = vmatpush3.bf16.msra.mxu1 %v528_v8  ;;  %v445_v8 = vld [vmem:[%s667_s6] ss:$0 sm:$0xff] }
   0xe   :  { %494 = vmatprep.subr.bf16.mxu1 %v529_v9 }
   0xf   :  { %507 = vmatpush3.bf16.msra.mxu0 %v531_v11 }
  0x10   :  { %508 = vmatprep.subr.bf16.mxu0 %v532_v41 }
  0x11   :  { %495 = vmatpush3.bf16.msra.mxu1 %v529_v9 }
  0x12   :  { %485 = vmatmul.mubr.msk.bf16.gmra.mrb[4].mxu0 %vm78_vm0, %v525_v7 }
  0x13   :  { %509 = vmatpush3.bf16.msra.mxu0 %v532_v41 }
  0x14   :  { %510 = vmatprep.subr.bf16.mxu0 %v533_v42 }
  0x17   :  { %511 = vmatpush3.bf16.msra.mxu0 %v533_v42 }
  0xdd   :  { %v482_v13 = vpop.f32.mrb[0].mxu0 }
  0xde   :  { %v134_v14 = vadd.f32 %v482_v13, %v425_v12  ;;  %v125_v15 = vpop.f32.mrb[1].mxu0 }
  0xdf   :  { %v126_v16 = vadd.f32 %v425_v12, %v125_v15  ;;  %v483_v17 = vpop.f32.mrb[2].mxu0 }
  0xe0   :  { %v137_v18 = vadd.f32 %v483_v17, %v425_v12  ;;  %v128_v19 = vpop.f32.mrb[3].mxu0  ;;  %v158_v21 = vmax.f32 %v134_v14, 0.0 }
  0xe1   :  { %v129_v20 = vadd.f32 %v425_v12, %v128_v19  ;;  %v156_v23 = vmax.f32 %v126_v16, 0.0 }
  0xe2   :  { %v159_v22 = vmax.f32 %v137_v18, 0.0 }
  0xe3   :  { %v157_v24 = vmax.f32 %v129_v20, 0.0 }
  0xe4   :  { %v165_v25 = vpack.c.bf16 %v159_v22, %v158_v21 }
  0xe5   :  { %v486_v26 = vpop.f32.mrb[4].mxu0  ;;  %v164_v27 = vpack.c.bf16 %v157_v24, %v156_v23 }
  0xe6   :  { %v150_v28 = vadd.f32 %v486_v26, %v425_v12  ;;  %v141_v29 = vpop.f32.mrb[5].mxu0 }
  0xe7   :  { %v142_v30 = vadd.f32 %v425_v12, %v141_v29  ;;  %v487_v31 = vpop.f32.mrb[6].mxu0  ;;  %496 = vmatprep.mubr.msk.bf16.mxu1 %vm207_vm1, %v164_v27 }
  0xe8   :  { %v153_v32 = vadd.f32 %v487_v31, %v425_v12  ;;  %v144_v33 = vpop.f32.mrb[7].mxu0  ;;  %497 = vmatmul.mubr.msk.bf16.vlgmr.msra.gmra.mrb[0].mxu1 %vm207_vm1, %v165_v25  ;;  %v162_v35 = vmax.f32 %v150_v28, 0.0 }
  0xe9   :  { %v145_v34 = vadd.f32 %v425_v12, %v144_v33  ;;  %v160_v37 = vmax.f32 %v142_v30, 0.0 }
  0xea   :  { %v163_v36 = vmax.f32 %v153_v32, 0.0 }
  0xeb   :  { %v161_v38 = vmax.f32 %v145_v34, 0.0 }
  0xec   :  { %v167_v39 = vpack.c.bf16 %v163_v36, %v162_v35 }
  0xed   :  { %v166_v40 = vpack.c.bf16 %v161_v38, %v160_v37 }
  0xef   :  { %500 = vmatprep.mubr.msk.bf16.mxu1 %vm207_vm1, %v166_v40 }
  0xf0   :  { %501 = vmatmul.mubr.msk.bf16.gmra.mrb[4].mxu1 %vm207_vm1, %v167_v39 }
 0x1bb   :  { %v498_v44 = vpop.f32.mrb[0].mxu1 }
 0x1bc   :  { %v263_v45 = vadd.f32 %v498_v44, %v436_v43  ;;  %v254_v46 = vpop.f32.mrb[1].mxu1 }
 0x1bd   :  { %v255_v47 = vadd.f32 %v436_v43, %v254_v46  ;;  %v499_v48 = vpop.f32.mrb[2].mxu1 }
 0x1be   :  { %v266_v49 = vadd.f32 %v499_v48, %v436_v43  ;;  %v257_v50 = vpop.f32.mrb[3].mxu1  ;;  %v287_v52 = vmax.f32 %v263_v45, 0.0 }
 0x1bf   :  { %v258_v51 = vadd.f32 %v436_v43, %v257_v50  ;;  %v285_v54 = vmax.f32 %v255_v47, 0.0 }
 0x1c0   :  { %v288_v53 = vmax.f32 %v266_v49, 0.0 }
 0x1c1   :  { %v286_v55 = vmax.f32 %v258_v51, 0.0 }
 0x1c2   :  { %v294_v56 = vpack.c.bf16 %v288_v53, %v287_v52 }
 0x1c3   :  { %v293_v57 = vpack.c.bf16 %v286_v55, %v285_v54  ;;  %v502_v58 = vpop.f32.mrb[4].mxu1 }
 0x1c4   :  { %v279_v59 = vadd.f32 %v502_v58, %v436_v43  ;;  %v270_v60 = vpop.f32.mrb[5].mxu1 }
 0x1c5   :  { %v271_v61 = vadd.f32 %v436_v43, %v270_v60  ;;  %v503_v62 = vpop.f32.mrb[6].mxu1  ;;  %512 = vmatprep.mubr.msk.bf16.mxu0 %vm207_vm1, %v293_v57 }
 0x1c6   :  { %v282_v63 = vadd.f32 %v503_v62, %v436_v43  ;;  %v273_v0 = vpop.f32.mrb[7].mxu1  ;;  %513 = vmatmul.mubr.msk.bf16.vlgmr.msra.gmra.mrb[8].mxu0 %vm207_vm1, %v294_v56  ;;  %v291_v2 = vmax.f32 %v279_v59, 0.0 }
 0x1c7   :  { %v274_v1 = vadd.f32 %v436_v43, %v273_v0  ;;  %v289_v4 = vmax.f32 %v271_v61, 0.0 }
 0x1c8   :  { %v292_v3 = vmax.f32 %v282_v63, 0.0 }
 0x1c9   :  { %v290_v5 = vmax.f32 %v274_v1, 0.0 }
 0x1ca   :  { %v296_v6 = vpack.c.bf16 %v292_v3, %v291_v2 }
 0x1cb   :  { %v295_v7 = vpack.c.bf16 %v290_v5, %v289_v4 }
 0x1cd   :  { %516 = vmatprep.mubr.msk.bf16.mxu0 %vm207_vm1, %v295_v7 }
 0x1ce   :  { %517 = vmatmul.mubr.msk.bf16.gmra.mrb[12].mxu0 %vm207_vm1, %v296_v6 }
 0x299   :  { %v514_v9 = vpop.f32.mrb[8].mxu0 }
 0x29a   :  { %v391_v10 = vadd.f32 %v514_v9, %v445_v8  ;;  %v382_v11 = vpop.f32.mrb[9].mxu0 }
 0x29b   :  { %v383_v12 = vadd.f32 %v445_v8, %v382_v11  ;;  %v515_v13 = vpop.f32.mrb[10].mxu0 }
 0x29c   :  { %415 = vst [vmem:[%s668_s7 + $0x10] sm:$0xff] %v391_v10  ;;  %v394_v14 = vadd.f32 %v515_v13, %v445_v8  ;;  %v385_v15 = vpop.f32.mrb[11].mxu0 }
 0x29d   :  { %413 = vst [vmem:[%s668_s7] sm:$0xff] %v383_v12  ;;  %v386_v16 = vadd.f32 %v445_v8, %v385_v15 }
 0x29e   :  { %416 = vst [vmem:[%s668_s7 + $0x18] sm:$0xff] %v394_v14 }
 0x29f   :  { %414 = vst [vmem:[%s668_s7 + $0x8] sm:$0xff] %v386_v16 }
 0x2a1   :  { %v518_v17 = vpop.f32.mrb[12].mxu0 }
 0x2a2   :  { %v407_v18 = vadd.f32 %v518_v17, %v445_v8  ;;  %v398_v19 = vpop.f32.mrb[13].mxu0 }
 0x2a3   :  { %v399_v20 = vadd.f32 %v445_v8, %v398_v19  ;;  %v519_v21 = vpop.f32.mrb[14].mxu0 }
 0x2a4   :  { %419 = vst [vmem:[%s668_s7 + $0x30] sm:$0xff] %v407_v18  ;;  %v410_v22 = vadd.f32 %v519_v21, %v445_v8  ;;  %v401_v23 = vpop.f32.mrb[15].mxu0 }
 0x2a5   :  { %417 = vst [vmem:[%s668_s7 + $0x20] sm:$0xff] %v399_v20  ;;  %v402_v24 = vadd.f32 %v445_v8, %v401_v23 }
 0x2a6   :  { %420 = vst [vmem:[%s668_s7 + $0x38] sm:$0xff] %v410_v22 }
 0x2a7   :  { %418 = vst [vmem:[%s668_s7 + $0x28] sm:$0xff] %v402_v24 }

</bundles_post_ra>
